<compile_context>
chip_gen: v7x
topology: tpu7x:2x2x1
jax: 0.10.0
libtpu: 0.0.40
codegen_flags: <defaults>
</compile_context>

<pallas_src>
import jax
import jax.numpy as jnp
from jax import lax
from jax.experimental import pallas as pl
from jax.experimental.pallas import tpu as pltpu

_EPS = 1e-8  # torch.nn.functional.cosine_similarity default eps

_VMEM_BLOCK_BUDGET = 16 * 1024 * 1024   # cap on double-buffered block footprint
_TARGET_STEP_BYTES = 2 * 1024 * 1024    # desired HBM traffic per grid step
_VMEM_LIMIT_BYTES = 32 * 1024 * 1024    # scoped VMEM limit, safe on v5e/v6e/v7x


def _cmce_kernel(fa_ref, fb_ref, fa_out_ref, fb_out_ref):
    # Block layout: (Bt, C, Nt) — channels on sublanes, spatial on lanes.
    fa = fa_ref[...].astype(jnp.float32)
    fb = fb_ref[...].astype(jnp.float32)

    # Cosine similarity along the channel axis, matching torch:
    # dot * rsqrt(max(||fa||^2 * ||fb||^2, eps^2)).  rsqrt goes to the EUP.
    dot = jnp.sum(fa * fb, axis=1, keepdims=True)      # (Bt, 1, Nt)
    na2 = jnp.sum(fa * fa, axis=1, keepdims=True)
    nb2 = jnp.sum(fb * fb, axis=1, keepdims=True)
    cos = dot * lax.rsqrt(jnp.maximum(na2 * nb2, _EPS * _EPS))

    # Residual cross-enhancement; fb update uses the pre-ReLU updated fa,
    # exactly as in the PyTorch forward.
    fa2 = fa + fb * cos
    fb2 = fb + fa2 * cos

    fa_out_ref[...] = jnp.maximum(fa2, 0.0).astype(fa_out_ref.dtype)
    fb_out_ref[...] = jnp.maximum(fb2, 0.0).astype(fb_out_ref.dtype)


def _choose_tiles(B, C, N):
    """VMEM-budget-aware (Bt, Nt) tile selection.

    Pipelined footprint per step = 2 (double buffer) x 4 arrays x Bt x C_pad
    x Nt x 4 B.  Pick Nt as large as the budget allows, then fold batches
    until each step moves >= ~2 MiB of HBM traffic, and finally guarantee at
    least 2 grid steps (when splittable) so v7x megacore uses both cores.
    """
    c_pad = max(8, ((C + 7) // 8) * 8)     # sublane padding for f32
    bytes_per_lane = c_pad * 4             # one (batch, lane) column

    def block_vmem(bt, nt):
        return 2 * 4 * bt * nt * bytes_per_lane

    def step_hbm(bt, nt):
        return 4 * bt * nt * bytes_per_lane

    # Lane tile: multiple of 128 (or the full extent when N < 128).
    if N < 128:
        nt = N
    else:
        nt_fit = _VMEM_BLOCK_BUDGET // (2 * 4 * bytes_per_lane)
        nt_fit = max(128, (nt_fit // 128) * 128)
        nt = min((N // 128) * 128, nt_fit)
    n_blocks = pl.cdiv(N, nt)

    # Batch tile: smallest divisor of B hitting the traffic target (or the
    # largest that still fits the block budget).
    bt = 1
    for d in range(1, B + 1):
        if B % d != 0:
            continue
        if block_vmem(d, nt) > _VMEM_BLOCK_BUDGET:
            break
        bt = d
        if step_hbm(d, nt) >= _TARGET_STEP_BYTES:
            break
    b_blocks = B // bt

    # Keep >= 2 grid steps when possible (megacore sharding on v7x).
    if b_blocks * n_blocks < 2:
        if B >= 2:
            bt = max(d for d in range(1, B) if B % d == 0)
            b_blocks = B // bt
        elif nt >= 256:
            nt = max(128, ((nt // 2 + 127) // 128) * 128)
            n_blocks = pl.cdiv(N, nt)

    return bt, nt, b_blocks, n_blocks


def cmce_forward(fa, fb):
    """fa, fb: (B, C, H, W). Returns (fa', fb'), each (B, C, H, W)."""
    B, C, H, W = fa.shape
    assert fb.shape == fa.shape
    N = H * W

    # NCHW -> (B, C, N) is a free (contiguous) reshape: no HBM transpose.
    fa_t = fa.reshape(B, C, N)
    fb_t = fb.reshape(B, C, N)

    bt, nt, b_blocks, n_blocks = _choose_tiles(B, C, N)
    grid = (b_blocks, n_blocks)

    spec = pl.BlockSpec((bt, C, nt), lambda b, n: (b, 0, n))

    itemsize = jnp.dtype(fa.dtype).itemsize
    cost = pl.CostEstimate(
        flops=12 * B * C * N,
        transcendentals=B * N,                     # one rsqrt per position
        bytes_accessed=4 * B * C * N * itemsize,   # 2 reads + 2 writes
    )

    fa_o, fb_o = pl.pallas_call(
        _cmce_kernel,
        out_shape=(
            jax.ShapeDtypeStruct((B, C, N), fa.dtype),
            jax.ShapeDtypeStruct((B, C, N), fb.dtype),
        ),
        grid=grid,
        in_specs=[spec, spec],
        out_specs=(spec, spec),
        compiler_params=pltpu.CompilerParams(
            dimension_semantics=("parallel", "parallel"),
            vmem_limit_bytes=_VMEM_LIMIT_BYTES,
        ),
        cost_estimate=cost,
    )(fa_t, fb_t)

    return fa_o.reshape(B, C, H, W), fb_o.reshape(B, C, H, W)


def cmce_reference(fa, fb):
    """Pure-JAX reference mirroring the PyTorch forward exactly."""
    dot = jnp.sum(fa * fb, axis=1, keepdims=True)
    na2 = jnp.sum(fa * fa, axis=1, keepdims=True)
    nb2 = jnp.sum(fb * fb, axis=1, keepdims=True)
    cos = dot * lax.rsqrt(jnp.maximum(na2 * nb2, _EPS * _EPS))
    fa2 = fa + fb * cos
    fb2 = fb + fa2 * cos
    return jax.nn.relu(fa2), jax.nn.relu(fb2)


if __name__ == "__main__":
    key = jax.random.PRNGKey(0)
    k1, k2, k3, k4 = jax.random.split(key, 4)

    # Case 1: module default in_channel=3, B=2, 16x16 spatial (N = 256).
    fa = jax.random.normal(k1, (2, 3, 16, 16), jnp.float32)
    fb = jax.random.normal(k2, (2, 3, 16, 16), jnp.float32)
    fa_o, fb_o = jax.block_until_ready(cmce_forward(fa, fb))
    fa_r, fb_r = cmce_reference(fa, fb)
    assert fa_o.shape == fa.shape and fb_o.shape == fb.shape
    assert jnp.allclose(fa_o, fa_r, atol=1e-5, rtol=1e-5), \
        float(jnp.max(jnp.abs(fa_o - fa_r)))
    assert jnp.allclose(fb_o, fb_r, atol=1e-5, rtol=1e-5), \
        float(jnp.max(jnp.abs(fb_o - fb_r)))

    # Case 2: ragged spatial extent (N = 130, not a multiple of 128) — exercises
    # the cdiv grid / masked boundary-block path.
    fa2 = jax.random.normal(k3, (1, 5, 10, 13), jnp.float32)
    fb2 = jax.random.normal(k4, (1, 5, 10, 13), jnp.float32)
    fa2_o, fb2_o = jax.block_until_ready(cmce_forward(fa2, fb2))
    fa2_r, fb2_r = cmce_reference(fa2, fb2)
    assert jnp.allclose(fa2_o, fa2_r, atol=1e-5, rtol=1e-5)
    assert jnp.allclose(fb2_o, fb2_r, atol=1e-5, rtol=1e-5)

    print("KERNEL_OK")
</pallas_src>

<mosaic_0001>
module attributes {stable_mosaic.version = 11 : i64} {
  func.func @_cmce_kernel(%arg0: i32, %arg1: i32, %arg2: memref<1x3x256xf32, #tpu.memory_space<vmem>>, %arg3: memref<1x3x256xf32, #tpu.memory_space<vmem>>, %arg4: memref<1x3x256xf32, #tpu.memory_space<vmem>>, %arg5: memref<1x3x256xf32, #tpu.memory_space<vmem>>) attributes {dimension_semantics = [#tpu.dimension_semantics<parallel>, #tpu.dimension_semantics<parallel>], iteration_bounds = array<i64: 2, 1>, scalar_prefetch = 0 : i64, scratch_operands = 0 : i64, tpu.core_type = #tpu.core_type<tc>, window_params = [{transform_indices = @transform_0, window_bounds = array<i64: 1, 3, 256>}, {transform_indices = @transform_1, window_bounds = array<i64: 1, 3, 256>}, {transform_indices = @transform_2, window_bounds = array<i64: 1, 3, 256>}, {transform_indices = @transform_3, window_bounds = array<i64: 1, 3, 256>}]} {
    %c0 = arith.constant 0 : index
    %c0_0 = arith.constant 0 : index
    %c0_1 = arith.constant 0 : index
    %0 = vector.load %arg2[%c0, %c0_0, %c0_1] : memref<1x3x256xf32, #tpu.memory_space<vmem>>, vector<1x3x256xf32>
    %c0_2 = arith.constant 0 : index
    %c0_3 = arith.constant 0 : index
    %c0_4 = arith.constant 0 : index
    %1 = vector.load %arg3[%c0_2, %c0_3, %c0_4] : memref<1x3x256xf32, #tpu.memory_space<vmem>>, vector<1x3x256xf32>
    %2 = arith.mulf %0, %1 : vector<1x3x256xf32>
    %cst = arith.constant dense<0.000000e+00> : vector<1x256xf32>
    %3 = vector.multi_reduction <add>, %2, %cst [1] : vector<1x3x256xf32> to vector<1x256xf32>
    %4 = vector.shape_cast %3 : vector<1x256xf32> to vector<1x1x256xf32>
    %5 = arith.mulf %0, %0 : vector<1x3x256xf32>
    %cst_5 = arith.constant dense<0.000000e+00> : vector<1x256xf32>
    %6 = vector.multi_reduction <add>, %5, %cst_5 [1] : vector<1x3x256xf32> to vector<1x256xf32>
    %7 = vector.shape_cast %6 : vector<1x256xf32> to vector<1x1x256xf32>
    %8 = arith.mulf %1, %1 : vector<1x3x256xf32>
    %cst_6 = arith.constant dense<0.000000e+00> : vector<1x256xf32>
    %9 = vector.multi_reduction <add>, %8, %cst_6 [1] : vector<1x3x256xf32> to vector<1x256xf32>
    %10 = vector.shape_cast %9 : vector<1x256xf32> to vector<1x1x256xf32>
    %11 = arith.mulf %7, %10 : vector<1x1x256xf32>
    %cst_7 = arith.constant 1.000000e-16 : f32
    %12 = vector.broadcast %cst_7 : f32 to vector<1x1x256xf32>
    %13 = arith.maximumf %11, %12 : vector<1x1x256xf32>
    %14 = math.rsqrt %13 : vector<1x1x256xf32>
    %15 = arith.mulf %4, %14 : vector<1x1x256xf32>
    %16 = vector.broadcast %15 : vector<1x1x256xf32> to vector<1x3x256xf32>
    %17 = arith.mulf %1, %16 : vector<1x3x256xf32>
    %18 = arith.addf %0, %17 : vector<1x3x256xf32>
    %19 = vector.broadcast %15 : vector<1x1x256xf32> to vector<1x3x256xf32>
    %20 = arith.mulf %18, %19 : vector<1x3x256xf32>
    %21 = arith.addf %1, %20 : vector<1x3x256xf32>
    %cst_8 = arith.constant 0.000000e+00 : f32
    %22 = vector.broadcast %cst_8 : f32 to vector<1x3x256xf32>
    %23 = arith.maximumf %18, %22 : vector<1x3x256xf32>
    %c0_9 = arith.constant 0 : index
    %c0_10 = arith.constant 0 : index
    %c0_11 = arith.constant 0 : index
    %24 = vector.load %arg4[%c0_9, %c0_10, %c0_11] : memref<1x3x256xf32, #tpu.memory_space<vmem>>, vector<1x3x256xf32>
    tpu.vector_store %arg4[%c0_9, %c0_10, %c0_11], %23 {strides = array<i32>} : memref<1x3x256xf32, #tpu.memory_space<vmem>>, vector<1x3x256xf32>,
    %cst_12 = arith.constant 0.000000e+00 : f32
    %25 = vector.broadcast %cst_12 : f32 to vector<1x3x256xf32>
    %26 = arith.maximumf %21, %25 : vector<1x3x256xf32>
    %c0_13 = arith.constant 0 : index
    %c0_14 = arith.constant 0 : index
    %c0_15 = arith.constant 0 : index
    %27 = vector.load %arg5[%c0_13, %c0_14, %c0_15] : memref<1x3x256xf32, #tpu.memory_space<vmem>>, vector<1x3x256xf32>
    tpu.vector_store %arg5[%c0_13, %c0_14, %c0_15], %26 {strides = array<i32>} : memref<1x3x256xf32, #tpu.memory_space<vmem>>, vector<1x3x256xf32>,
    return
  }
  func.func @transform_0(%arg0: i32, %arg1: i32) -> (i32, i32, i32) {
    %c0_i32 = arith.constant 0 : i32
    %c0_i32_0 = arith.constant 0 : i32
    return %arg0, %c0_i32, %arg1 : i32, i32, i32
  }
  func.func @transform_1(%arg0: i32, %arg1: i32) -> (i32, i32, i32) {
    %c0_i32 = arith.constant 0 : i32
    %c0_i32_0 = arith.constant 0 : i32
    return %arg0, %c0_i32, %arg1 : i32, i32, i32
  }
  func.func @transform_2(%arg0: i32, %arg1: i32) -> (i32, i32, i32) {
    %c0_i32 = arith.constant 0 : i32
    %c0_i32_0 = arith.constant 0 : i32
    return %arg0, %c0_i32, %arg1 : i32, i32, i32
  }
  func.func @transform_3(%arg0: i32, %arg1: i32) -> (i32, i32, i32) {
    %c0_i32 = arith.constant 0 : i32
    %c0_i32_0 = arith.constant 0 : i32
    return %arg0, %c0_i32, %arg1 : i32, i32, i32
  }
}

</mosaic_0001>

<bundles_post_ra>
// kernel: tpu_custom_call.1
= control target key start
LH: loop header
LB: loop body
LE: loop exit
PB: predicated region body
PF: predicated region fallthrough
CT: control target
= control target key end

     0   :  { %s593_s12 = smov 0   ;;  %s595_s13 = smov 0   ;;  %s657_s0 = inlined_call_operand.vmem [shape: f32[2,3,256], index: 0, kind: input, shape index: {}]   ;;  %s658_s1 = inlined_call_operand.vmem [shape: f32[2,3,256], index: 1, kind: input, shape index: {}]   ;;  %s659_s2 = inlined_call_operand.vmem [shape: f32[2,3,256], index: 2, kind: output, shape index: {0}]   ;;  %s660_s3 = inlined_call_operand.vmem [shape: f32[2,3,256], index: 3, kind: output, shape index: {1}]  }
   0x1   :  { %s597_s14 = smov 0  }
   0x2 LB: > { %s26_s15 = sadd.s32 1, %s567_s13  ;;  %p506_p0 = scmp.ge.s32.totalorder %s571_s14, 1  ;;  %s571_s14 = sphi %s597_s14, %s14_s14   ;;  %s567_s13 = sphi %s595_s13, %s662_s13   ;;  %s563_s12 = sphi %s593_s12, %s661_s12  }
   0x3   : > { %p28_p1 = scmp.ge.s32.totalorder %s26_s15, 2  ;;  %p180_p2 = scmp.lt.s32.totalorder %s571_s14, 3 }
   0x5   : > { %s664_s15 = smov (%p28_p1, %s26_s15), 0  ;;  %p181_p3 = pnand %p506_p0, %p180_p2 }
   0x6   : > { %p231_p4 = scmp.lt.s32.totalorder (!%p181_p3), %s563_s12, 1  ;;  %vm276_vm0 = vcmask (!%p181_p3), 1042432  }
   0x7   : > { %184 = sbr.rel (%p181_p3) target bundleno = 66 (0x42), region = 28 }
   0xe   : > { %s666_s12 = smov (!%p231_p4, %s563_s12), 1 }
   0xf   : > { %s611_s16 = sshll.u32 %s666_s12, 3 }
  0x10   : > { %s238_s19 = scalar_lea.vmem %s657_s0, %s611_s16  ;;  %s248_s22 = scalar_lea.vmem %s658_s1, %s611_s16 }
  0x11   : > { %v621_v0 = vld [vmem:[%s238_s19] sm:$0x77]  ;;  %s258_s25 = scalar_lea.vmem %s659_s2, %s611_s16  ;;  %s268_s28 = scalar_lea.vmem %s660_s3, %s611_s16 }
  0x12   : > { %v623_v1 = vld [vmem:[%s248_s22] sm:$0x77]  ;;  %v291_v3 = vmul.f32 %v621_v0, %v621_v0 }
  0x13   : > { %v272_v2 = vmul.f32 %v623_v1, %v621_v0  ;;  %v309_v4 = vmul.f32 %v623_v1, %v623_v1 }
  0x14   : > { %v293_v5 = vcombine.high %v291_v3, %v291_v3  ;;  %v295_v6 = vsel %vm276_vm0, %v291_v3, 0.0 }
  0x15   : > { %v296_v7 = vrot.slane %v295_v6, 4  ;;  %v311_v8 = vcombine.high %v309_v4, %v309_v4  ;;  %v313_v9 = vsel %vm276_vm0, %v309_v4, 0.0  ;;  %v274_v10 = vcombine.high %v272_v2, %v272_v2 }
  0x16   : > { %v302_v11 = vsel %vm276_vm0, %v293_v5, 0.0  ;;  %v314_v12 = vrot.slane %v313_v9, 4  ;;  %v277_v15 = vsel %vm276_vm0, %v272_v2, 0.0 }
  0x17   : > { %v297_v13 = vadd.f32 %v296_v7, %v295_v6  ;;  %v303_v14 = vrot.slane %v302_v11, 4  ;;  %v320_v17 = vsel %vm276_vm0, %v311_v8, 0.0  ;;  %v284_v20 = vsel %vm276_vm0, %v274_v10, 0.0 }
  0x18   : > { %v315_v16 = vadd.f32 %v314_v12, %v313_v9  ;;  %v321_v22 = vrot.slane %v320_v17, 4  ;;  %v278_v23 = vrot.slane %v277_v15, 4  ;;  %v285_v28 = vrot.slane %v284_v20, 4 }
  0x19   : > { %v298_v18 = vrot.slane %v297_v13, 2  ;;  %v304_v19 = vadd.f32 %v303_v14, %v302_v11 }
  0x1a   : > { %v316_v21 = vrot.slane %v315_v16, 2  ;;  %v322_v27 = vadd.f32 %v321_v22, %v320_v17  ;;  %v279_v33 = vadd.f32 %v278_v23, %v277_v15  ;;  %v286_v38 = vadd.f32 %v285_v28, %v284_v20 }
  0x1b   : > { %v299_v24 = vadd.f32 %v298_v18, %v297_v13  ;;  %v305_v25 = vrot.slane %v304_v19, 2 }
  0x1c   : > { %v317_v26 = vadd.f32 %v316_v21, %v315_v16  ;;  %v323_v32 = vrot.slane %v322_v27, 2  ;;  %v280_v42 = vrot.slane %v279_v33, 2  ;;  %v287_v45 = vrot.slane %v286_v38, 2 }
  0x1d   : > { %v300_v29 = vrot.slane %v299_v24, 1  ;;  %v306_v30 = vadd.f32 %v305_v25, %v304_v19 }
  0x1e   : > { %v318_v31 = vrot.slane %v317_v26, 1  ;;  %v324_v37 = vadd.f32 %v323_v32, %v322_v27  ;;  %v281_v47 = vadd.f32 %v280_v42, %v279_v33  ;;  %v288_v49 = vadd.f32 %v287_v45, %v286_v38 }
  0x1f   : > { %v301_v34 = vadd.f32 %v300_v29, %v299_v24  ;;  %v307_v35 = vrot.slane %v306_v30, 1 }
  0x20   : > { %v319_v36 = vadd.f32 %v318_v31, %v317_v26  ;;  %v325_v40 = vrot.slane %v324_v37, 1  ;;  %v282_v50 = vrot.slane %v281_v47, 1  ;;  %v289_v51 = vrot.slane %v288_v49, 1 }
  0x21   : > { %v308_v39 = vadd.f32 %v307_v35, %v306_v30 }
  0x22   : > { %v327_v41 = vmul.f32 %v319_v36, %v301_v34  ;;  %v326_v43 = vadd.f32 %v325_v40, %v324_v37  ;;  %v283_v52 = vadd.f32 %v282_v50, %v281_v47  ;;  %v290_v54 = vadd.f32 %v289_v51, %v288_v49 }
  0x24   : > { %v329_v44 = vmax.f32 %v327_v41, 1e-16  ;;  %v328_v46 = vmul.f32 %v326_v43, %v308_v39 }
  0x26   : > { %545 = vrsqrt.f32 %v329_v44  ;;  %v330_v48 = vmax.f32 %v328_v46, 1e-16 }
  0x28   : > { %547 = vrsqrt.f32 %v330_v48 }
  0x30   : > { %v546_v53 = vpop.eup %545 }
  0x31   : > { %v333_v55 = vmul.f32 %v546_v53, %v283_v52 }
  0x32   : > { %v548_v56 = vpop.eup %547 }
  0x33   : > { %v334_v57 = vmul.f32 %v548_v56, %v290_v54 }
  0x35   : > { %v337_v58 = vcombine.low %v333_v55, %v334_v57 }
  0x37   : > { %v339_v59 = vmul.f32 %v337_v58, %v623_v1 }
  0x39   : > { %v340_v60 = vadd.f32 %v339_v59, %v621_v0 }
  0x3b   : > { %v343_v61 = vmax.f32 %v340_v60, 0.0  ;;  %v341_v62 = vmul.f32 %v340_v60, %v337_v58 }
  0x3d   : > { %344 = vst [vmem:[%s258_s25] sm:$0x77] %v343_v61  ;;  %v342_v63 = vadd.f32 %v341_v62, %v623_v1 }
  0x3f   : > { %v345_v2 = vmax.f32 %v342_v63, 0.0 }
  0x41   : > { %346 = vst [vmem:[%s268_s28] sm:$0x77] %v345_v2 }
  0x42 PF: > { %s14_s14 = sadd.s32 1, %s571_s14   ;;  %s661_s12 = smov %s567_s13 }
  0x43   : > { %p11_p5 = scmp.ge.s32.totalorder %s14_s14, 4   ;;  %s662_s13 = smov %s664_s15 }
  0x45   :  { %13 = sbr.rel (!%p11_p5) target bundleno = 2 (0x2), region = 73 }

</bundles_post_ra>
